<compile_context>
chip_gen: v6e
topology: v6e:2x2x1
jax: 0.10.0
libtpu: 0.0.40
codegen_flags: <defaults>
</compile_context>

<pallas_src>
import functools

import jax
import jax.numpy as jnp
from jax.experimental import pallas as pl
from jax.experimental.pallas import tpu as pltpu


def _round_up(v, m):
    return ((v + m - 1) // m) * m


# ----------------------------- Pallas kernel ---------------------------------
def fedrod_kernel(patches_ref, wconv_ref, bconv_ref,
                  wfc_ref, bfc_ref,
                  wheads_ref, bheads_ref,
                  logits_ref, plogits_ref,
                  *, n, hw, kpad):
    # conv-as-matmul (lane-padded im2col done in glue): bf16 x bf16 -> f32 acc
    conv = jnp.dot(patches_ref[...], wconv_ref[...],
                   preferred_element_type=jnp.float32)            # (n*hw, COPAD)
    conv = jnp.maximum(conv + bconv_ref[...], 0.0)

    # global average pool: per-batch sublane reduction (no pooling matrix)
    segs = [jnp.sum(conv[b * hw:(b + 1) * hw, :], axis=0, keepdims=True)
            for b in range(n)]
    pooled = jnp.concatenate(segs, axis=0) * (1.0 / hw)           # (n, COPAD)

    # feature layer: hs = relu(pooled @ Wfc + bfc)
    hs = jnp.dot(pooled.astype(jnp.bfloat16), wfc_ref[...],
                 preferred_element_type=jnp.float32)
    hs = jnp.maximum(hs + bfc_ref[...], 0.0)                      # (n, HIDPAD)

    # fused classifier heads: one (HIDPAD, 2*kpad) matmul, then split + fuse
    heads = jnp.dot(hs.astype(jnp.bfloat16), wheads_ref[...],
                    preferred_element_type=jnp.float32) + bheads_ref[...]
    g = heads[:, :kpad]                                           # global head
    p = heads[:, kpad:]                                           # private head

    logits_ref[...] = g
    plogits_ref[...] = 0.5 * (p + g)


# ------------------------------ JAX wrapper -----------------------------------
def _full_spec(shape):
    ndim = len(shape)
    return pl.BlockSpec(shape, lambda i, _n=ndim: (0,) * _n)


def im2col_lane_padded(x, ck_pad, kh=3, kw=3):
    """x: (N, C, H, W) -> lane-padded patches (N*H*W, ck_pad), bf16.

    Column order is tap-major, channel-minor: col = (i*kw + j)*C + c.
    """
    N, C, H, W = x.shape
    xh = jnp.transpose(x, (0, 2, 3, 1))                           # NHWC
    xhp = jnp.pad(xh, ((0, 0), (1, 1), (1, 1), (0, 0)))
    taps = [xhp[:, i:i + H, j:j + W, :] for i in range(kh) for j in range(kw)]
    patches = jnp.concatenate(taps, axis=-1)                      # (N,H,W,kh*kw*C)
    patches = patches.reshape(N * H * W, kh * kw * C)
    patches = jnp.pad(patches, ((0, 0), (0, ck_pad - kh * kw * C)))
    return patches.astype(jnp.bfloat16)


@jax.jit
def fedrod_forward(x, params):
    N, C, H, W = x.shape
    wconv, bconv, wfc, bfc, wcls, bcls, wpriv, bpriv = params
    Co = wconv.shape[0]
    Hid = wfc.shape[0]
    K = wcls.shape[0]
    HW = H * W

    CKPAD = _round_up(C * 9, 128)
    COPAD = _round_up(Co, 128)
    HIDPAD = _round_up(Hid, 128)
    KPAD = _round_up(K, 128)

    # lane-padded im2col (tap-major, channel-minor columns)
    patches = im2col_lane_padded(x, CKPAD)                        # (N*H*W, CKPAD) bf16

    # conv weight reordered to match patch columns: row = (i*3+j)*C + c
    wconv_m = wconv.transpose(2, 3, 1, 0).reshape(9 * C, Co)      # (9C, Co)
    wconv_m = jnp.pad(wconv_m, ((0, CKPAD - 9 * C), (0, COPAD - Co))
                      ).astype(jnp.bfloat16)
    bconv_p = jnp.pad(bconv, (0, COPAD - Co)).reshape(1, COPAD)

    wfc_m = jnp.pad(wfc.T, ((0, COPAD - Co), (0, HIDPAD - Hid))).astype(jnp.bfloat16)
    bfc_p = jnp.pad(bfc, (0, HIDPAD - Hid)).reshape(1, HIDPAD)

    # fused heads: [global | private], each lane-padded to KPAD
    wcls_p = jnp.pad(wcls.T, ((0, HIDPAD - Hid), (0, KPAD - K)))
    wpriv_p = jnp.pad(wpriv.T, ((0, HIDPAD - Hid), (0, KPAD - K)))
    wheads = jnp.concatenate([wcls_p, wpriv_p], axis=1).astype(jnp.bfloat16)
    bheads = jnp.concatenate([jnp.pad(bcls, (0, KPAD - K)),
                              jnp.pad(bpriv, (0, KPAD - K))]).reshape(1, 2 * KPAD)

    ins = (patches, wconv_m, bconv_p, wfc_m, bfc_p, wheads, bheads)

    flops = (2 * N * HW * CKPAD * COPAD
             + 2 * N * COPAD * HIDPAD
             + 2 * N * HIDPAD * 2 * KPAD)
    bytes_accessed = sum(int(a.size) * a.dtype.itemsize for a in ins) \
        + 2 * N * KPAD * 4

    logits_pad, plogits_pad = pl.pallas_call(
        functools.partial(fedrod_kernel, n=N, hw=HW, kpad=KPAD),
        grid=(1,),
        in_specs=[_full_spec(a.shape) for a in ins],
        out_specs=(_full_spec((N, KPAD)), _full_spec((N, KPAD))),
        out_shape=(jax.ShapeDtypeStruct((N, KPAD), jnp.float32),
                   jax.ShapeDtypeStruct((N, KPAD), jnp.float32)),
        compiler_params=pltpu.CompilerParams(
            dimension_semantics=("arbitrary",)),
        cost_estimate=pl.CostEstimate(flops=flops, transcendentals=0,
                                      bytes_accessed=bytes_accessed),
    )(*ins)

    return logits_pad[:, :K], plogits_pad[:, :K]


def reference_forward(x, params):
    """Pure-JAX reference mirroring the PyTorch module semantics."""
    wconv, bconv, wfc, bfc, wcls, bcls, wpriv, bpriv = params
    y = jax.lax.conv_general_dilated(
        x, wconv, window_strides=(1, 1), padding="SAME",
        dimension_numbers=("NCHW", "OIHW", "NCHW"))
    y = jnp.maximum(y + bconv[None, :, None, None], 0.0)
    pooled = y.mean(axis=(2, 3))                                  # (N, Co)
    hs = jnp.maximum(pooled @ wfc.T + bfc, 0.0)                   # (N, Hid)
    logits = hs @ wcls.T + bcls
    plogits = hs @ wpriv.T + bpriv
    plogits = 0.5 * (plogits + logits)
    return logits, plogits


def init_params(key, C=4, Co=8, Hid=32, K=10):
    ks = jax.random.split(key, 8)
    wconv = jax.random.normal(ks[0], (Co, C, 3, 3), jnp.float32) * 0.1
    bconv = jax.random.normal(ks[1], (Co,), jnp.float32) * 0.1
    wfc = jax.random.normal(ks[2], (Hid, Co), jnp.float32) * 0.1
    bfc = jax.random.normal(ks[3], (Hid,), jnp.float32) * 0.1
    wcls = jax.random.normal(ks[4], (K, Hid), jnp.float32) * 0.1
    bcls = jax.random.normal(ks[5], (K,), jnp.float32) * 0.1
    # private_classifier: same shape as classifier, independently (re)initialized
    wpriv = jax.random.normal(ks[6], (K, Hid), jnp.float32) * 0.1
    bpriv = jax.random.normal(ks[7], (K,), jnp.float32) * 0.1
    return (wconv, bconv, wfc, bfc, wcls, bcls, wpriv, bpriv)


if __name__ == "__main__":
    key = jax.random.PRNGKey(0)
    kx, kp = jax.random.split(key)
    x = jax.random.normal(kx, (2, 4, 16, 16), jnp.float32)        # NCHW
    params = init_params(kp)

    logits, plogits = fedrod_forward(x, params)
    jax.block_until_ready((logits, plogits))

    ref_logits, ref_plogits = reference_forward(x, params)
    # bf16 matmul operands -> loosened tolerance vs pure-f32 reference
    assert jnp.allclose(logits, ref_logits, atol=1e-2, rtol=1e-2)
    assert jnp.allclose(plogits, ref_plogits, atol=1e-2, rtol=1e-2)

    print("KERNEL_OK")
</pallas_src>

<mosaic_0001>
module attributes {stable_mosaic.version = 11 : i64} {
  func.func @fedrod_kernel(%arg0: i32, %arg1: memref<512x128xbf16, #tpu.memory_space<vmem>>, %arg2: memref<128x128xbf16, #tpu.memory_space<vmem>>, %arg3: memref<1x128xf32, #tpu.memory_space<vmem>>, %arg4: memref<128x128xbf16, #tpu.memory_space<vmem>>, %arg5: memref<1x128xf32, #tpu.memory_space<vmem>>, %arg6: memref<128x256xbf16, #tpu.memory_space<vmem>>, %arg7: memref<1x256xf32, #tpu.memory_space<vmem>>, %arg8: memref<2x128xf32, #tpu.memory_space<vmem>>, %arg9: memref<2x128xf32, #tpu.memory_space<vmem>>) attributes {dimension_semantics = [#tpu.dimension_semantics<arbitrary>], iteration_bounds = array<i64: 1>, scalar_prefetch = 0 : i64, scratch_operands = 0 : i64, tpu.core_type = #tpu.core_type<tc>, window_params = [{pipeline_mode = #tpu.pipeline_mode<synchronous>, transform_indices = @transform_0, window_bounds = array<i64: 512, 128>}, {pipeline_mode = #tpu.pipeline_mode<synchronous>, transform_indices = @transform_1, window_bounds = array<i64: 128, 128>}, {pipeline_mode = #tpu.pipeline_mode<synchronous>, transform_indices = @transform_2, window_bounds = array<i64: 1, 128>}, {pipeline_mode = #tpu.pipeline_mode<synchronous>, transform_indices = @transform_3, window_bounds = array<i64: 128, 128>}, {pipeline_mode = #tpu.pipeline_mode<synchronous>, transform_indices = @transform_4, window_bounds = array<i64: 1, 128>}, {pipeline_mode = #tpu.pipeline_mode<synchronous>, transform_indices = @transform_5, window_bounds = array<i64: 128, 256>}, {pipeline_mode = #tpu.pipeline_mode<synchronous>, transform_indices = @transform_6, window_bounds = array<i64: 1, 256>}, {pipeline_mode = #tpu.pipeline_mode<synchronous>, transform_indices = @transform_7, window_bounds = array<i64: 2, 128>}, {pipeline_mode = #tpu.pipeline_mode<synchronous>, transform_indices = @transform_8, window_bounds = array<i64: 2, 128>}]} {
    %c0 = arith.constant 0 : index
    %c0_0 = arith.constant 0 : index
    %0 = vector.load %arg1[%c0, %c0_0] : memref<512x128xbf16, #tpu.memory_space<vmem>>, vector<512x128xbf16>
    %c0_1 = arith.constant 0 : index
    %c0_2 = arith.constant 0 : index
    %1 = vector.load %arg2[%c0_1, %c0_2] : memref<128x128xbf16, #tpu.memory_space<vmem>>, vector<128x128xbf16>
    %cst = arith.constant dense<0.000000e+00> : vector<512x128xf32>
    %2 = tpu.matmul %0, %1, %cst {dimension_numbers = #tpu.dot_dimension_numbers<[1], [0], [0], [1], [0, 0, 1, 1], [], []>} : vector<512x128xbf16>, vector<128x128xbf16>, vector<512x128xf32> -> vector<512x128xf32>
    %c0_3 = arith.constant 0 : index
    %c0_4 = arith.constant 0 : index
    %3 = vector.load %arg3[%c0_3, %c0_4] : memref<1x128xf32, #tpu.memory_space<vmem>>, vector<1x128xf32>
    %4 = vector.broadcast %3 : vector<1x128xf32> to vector<512x128xf32>
    %5 = arith.addf %2, %4 : vector<512x128xf32>
    %cst_5 = arith.constant 0.000000e+00 : f32
    %6 = vector.broadcast %cst_5 : f32 to vector<512x128xf32>
    %7 = arith.maximumf %5, %6 : vector<512x128xf32>
    %8 = vector.extract_strided_slice %7 {offsets = [0, 0], sizes = [256, 128], strides = [1, 1]} : vector<512x128xf32> to vector<256x128xf32>
    %cst_6 = arith.constant dense<0.000000e+00> : vector<128xf32>
    %9 = vector.multi_reduction <add>, %8, %cst_6 [0] : vector<256x128xf32> to vector<128xf32>
    %10 = vector.shape_cast %9 : vector<128xf32> to vector<1x128xf32>
    %11 = vector.extract_strided_slice %7 {offsets = [256, 0], sizes = [256, 128], strides = [1, 1]} : vector<512x128xf32> to vector<256x128xf32>
    %cst_7 = arith.constant dense<0.000000e+00> : vector<128xf32>
    %12 = vector.multi_reduction <add>, %11, %cst_7 [0] : vector<256x128xf32> to vector<128xf32>
    %13 = vector.shape_cast %12 : vector<128xf32> to vector<1x128xf32>
    %14 = tpu.concatenate %10, %13 in 0 : vector<1x128xf32>, vector<1x128xf32> -> vector<2x128xf32>
    %cst_8 = arith.constant 3.906250e-03 : f32
    %15 = vector.broadcast %cst_8 : f32 to vector<2x128xf32>
    %16 = arith.mulf %14, %15 : vector<2x128xf32>
    %17 = arith.truncf %16 : vector<2x128xf32> to vector<2x128xbf16>
    %c0_9 = arith.constant 0 : index
    %c0_10 = arith.constant 0 : index
    %18 = vector.load %arg4[%c0_9, %c0_10] : memref<128x128xbf16, #tpu.memory_space<vmem>>, vector<128x128xbf16>
    %cst_11 = arith.constant dense<0.000000e+00> : vector<2x128xf32>
    %19 = tpu.matmul %17, %18, %cst_11 {dimension_numbers = #tpu.dot_dimension_numbers<[1], [0], [0], [1], [0, 0, 1, 1], [], []>} : vector<2x128xbf16>, vector<128x128xbf16>, vector<2x128xf32> -> vector<2x128xf32>
    %c0_12 = arith.constant 0 : index
    %c0_13 = arith.constant 0 : index
    %20 = vector.load %arg5[%c0_12, %c0_13] : memref<1x128xf32, #tpu.memory_space<vmem>>, vector<1x128xf32>
    %21 = vector.broadcast %20 : vector<1x128xf32> to vector<2x128xf32>
    %22 = arith.addf %19, %21 : vector<2x128xf32>
    %cst_14 = arith.constant 0.000000e+00 : f32
    %23 = vector.broadcast %cst_14 : f32 to vector<2x128xf32>
    %24 = arith.maximumf %22, %23 : vector<2x128xf32>
    %25 = arith.truncf %24 : vector<2x128xf32> to vector<2x128xbf16>
    %c0_15 = arith.constant 0 : index
    %c0_16 = arith.constant 0 : index
    %26 = vector.load %arg6[%c0_15, %c0_16] : memref<128x256xbf16, #tpu.memory_space<vmem>>, vector<128x256xbf16>
    %cst_17 = arith.constant dense<0.000000e+00> : vector<2x256xf32>
    %27 = tpu.matmul %25, %26, %cst_17 {dimension_numbers = #tpu.dot_dimension_numbers<[1], [0], [0], [1], [0, 0, 1, 1], [], []>} : vector<2x128xbf16>, vector<128x256xbf16>, vector<2x256xf32> -> vector<2x256xf32>
    %c0_18 = arith.constant 0 : index
    %c0_19 = arith.constant 0 : index
    %28 = vector.load %arg7[%c0_18, %c0_19] : memref<1x256xf32, #tpu.memory_space<vmem>>, vector<1x256xf32>
    %29 = vector.broadcast %28 : vector<1x256xf32> to vector<2x256xf32>
    %30 = arith.addf %27, %29 : vector<2x256xf32>
    %31 = vector.extract_strided_slice %30 {offsets = [0, 0], sizes = [2, 128], strides = [1, 1]} : vector<2x256xf32> to vector<2x128xf32>
    %32 = vector.extract_strided_slice %30 {offsets = [0, 128], sizes = [2, 128], strides = [1, 1]} : vector<2x256xf32> to vector<2x128xf32>
    %c0_20 = arith.constant 0 : index
    %c0_21 = arith.constant 0 : index
    %33 = vector.load %arg8[%c0_20, %c0_21] : memref<2x128xf32, #tpu.memory_space<vmem>>, vector<2x128xf32>
    tpu.vector_store %arg8[%c0_20, %c0_21], %31 {strides = array<i32>} : memref<2x128xf32, #tpu.memory_space<vmem>>, vector<2x128xf32>,
    %34 = arith.addf %32, %31 : vector<2x128xf32>
    %cst_22 = arith.constant 5.000000e-01 : f32
    %35 = vector.broadcast %cst_22 : f32 to vector<2x128xf32>
    %36 = arith.mulf %35, %34 : vector<2x128xf32>
    %c0_23 = arith.constant 0 : index
    %c0_24 = arith.constant 0 : index
    %37 = vector.load %arg9[%c0_23, %c0_24] : memref<2x128xf32, #tpu.memory_space<vmem>>, vector<2x128xf32>
    tpu.vector_store %arg9[%c0_23, %c0_24], %36 {strides = array<i32>} : memref<2x128xf32, #tpu.memory_space<vmem>>, vector<2x128xf32>,
    return
  }
  func.func @transform_0(%arg0: i32) -> (i32, i32) {
    %c0_i32 = arith.constant 0 : i32
    %c0_i32_0 = arith.constant 0 : i32
    %c0_i32_1 = arith.constant 0 : i32
    return %c0_i32, %c0_i32_0 : i32, i32
  }
  func.func @transform_1(%arg0: i32) -> (i32, i32) {
    %c0_i32 = arith.constant 0 : i32
    %c0_i32_0 = arith.constant 0 : i32
    %c0_i32_1 = arith.constant 0 : i32
    return %c0_i32, %c0_i32_0 : i32, i32
  }
  func.func @transform_2(%arg0: i32) -> (i32, i32) {
    %c0_i32 = arith.constant 0 : i32
    %c0_i32_0 = arith.constant 0 : i32
    %c0_i32_1 = arith.constant 0 : i32
    return %c0_i32, %c0_i32_0 : i32, i32
  }
  func.func @transform_3(%arg0: i32) -> (i32, i32) {
    %c0_i32 = arith.constant 0 : i32
    %c0_i32_0 = arith.constant 0 : i32
    %c0_i32_1 = arith.constant 0 : i32
    return %c0_i32, %c0_i32_0 : i32, i32
  }
  func.func @transform_4(%arg0: i32) -> (i32, i32) {
    %c0_i32 = arith.constant 0 : i32
    %c0_i32_0 = arith.constant 0 : i32
    %c0_i32_1 = arith.constant 0 : i32
    return %c0_i32, %c0_i32_0 : i32, i32
  }
  func.func @transform_5(%arg0: i32) -> (i32, i32) {
    %c0_i32 = arith.constant 0 : i32
    %c0_i32_0 = arith.constant 0 : i32
    %c0_i32_1 = arith.constant 0 : i32
    return %c0_i32, %c0_i32_0 : i32, i32
  }
  func.func @transform_6(%arg0: i32) -> (i32, i32) {
    %c0_i32 = arith.constant 0 : i32
    %c0_i32_0 = arith.constant 0 : i32
    %c0_i32_1 = arith.constant 0 : i32
    return %c0_i32, %c0_i32_0 : i32, i32
  }
  func.func @transform_7(%arg0: i32) -> (i32, i32) {
    %c0_i32 = arith.constant 0 : i32
    %c0_i32_0 = arith.constant 0 : i32
    %c0_i32_1 = arith.constant 0 : i32
    return %c0_i32, %c0_i32_0 : i32, i32
  }
  func.func @transform_8(%arg0: i32) -> (i32, i32) {
    %c0_i32 = arith.constant 0 : i32
    %c0_i32_0 = arith.constant 0 : i32
    %c0_i32_1 = arith.constant 0 : i32
    return %c0_i32, %c0_i32_0 : i32, i32
  }
}

</mosaic_0001>

<bundles_post_ra>
// kernel: fedrod_forward.1
= control target key start
LH: loop header
LB: loop body
LE: loop exit
PB: predicated region body
PF: predicated region fallthrough
CT: control target
= control target key end

     0   :  { %14 = vsyncpa [#allocation3], 0  ;;  %s1783_s0 = inlined_call_operand.vmem [shape: bf16[512,128], index: 0, kind: input, shape index: {}]   ;;  %s1784_s1 = inlined_call_operand.vmem [shape: bf16[128,128], index: 1, kind: input, shape index: {}]   ;;  %s1785_s2 = inlined_call_operand.vmem [shape: f32[1,128], index: 2, kind: input, shape index: {}]   ;;  %s1786_s3 = inlined_call_operand.vmem [shape: bf16[128,128], index: 3, kind: input, shape index: {}]   ;;  %s1787_s4 = inlined_call_operand.vmem [shape: f32[1,128], index: 4, kind: input, shape index: {}]   ;;  %s1788_s5 = inlined_call_operand.vmem [shape: bf16[128,256], index: 5, kind: input, shape index: {}]   ;;  %s1789_s6 = inlined_call_operand.vmem [shape: f32[1,256], index: 6, kind: input, shape index: {}]   ;;  %s1790_s7 = inlined_call_operand.hbm [shape: f32[2,128], index: 7, kind: output, shape index: {0}]   ;;  %s1791_s8 = inlined_call_operand.hbm [shape: f32[2,128], index: 8, kind: output, shape index: {1}]  }
   0x1   :  { %v1319_v0 = vld [vmem:[%s1784_s1 + $0x38] sm:$0xff]   ;;  %v1320_v1 = vld [vmem:[%s1784_s1 + $0x30] sm:$0xff]   ;;  %v1321_v2 = vld [vmem:[%s1784_s1 + $0x28] sm:$0xff]  }
   0x2   :  { %1198 = vmatprep.subr.bf16.mxu0 %v1319_v0  ;;  %1298 = vmatprep.subr.bf16.mxu1 %v1319_v0  ;;  %v1322_v3 = vld [vmem:[%s1784_s1 + $0x20] sm:$0xff]   ;;  %v1323_v5 = vld [vmem:[%s1784_s1 + $0x18] sm:$0xff]   ;;  %v1324_v6 = vld [vmem:[%s1784_s1 + $0x10] sm:$0xff]  }
   0x3   :  { %1199 = vmatpush3.bf16.msra.mxu0 %v1319_v0  ;;  %1306 = vmatpush3.bf16.msra.mxu1 %v1319_v0  ;;  %v1327_v4 = vld [vmem:[%s1783_s0] sm:$0xff]   ;;  %v1325_v7 = vld [vmem:[%s1784_s1 + $0x8] sm:$0xff]   ;;  %v1329_v10 = vld [vmem:[%s1783_s0 + $0x10] sm:$0xff]  }
   0x4   :  { %1200 = vmatprep.subr.bf16.mxu0 %v1320_v1  ;;  %1299 = vmatprep.subr.bf16.mxu1 %v1320_v1  ;;  %v1326_v8 = vld [vmem:[%s1784_s1] sm:$0xff]   ;;  %v1328_v9 = vld [vmem:[%s1783_s0 + $0x8] sm:$0xff]   ;;  %v1349_v11 = vld [vmem:[%s1783_s0 + $0xb0] sm:$0xff]  }
   0x5   :  { %1214 = vmatprep.mubr.bf16.mxu0 %v1327_v4  ;;  %v1350_v12 = vld [vmem:[%s1783_s0 + $0xb8] sm:$0xff]   ;;  %1258 = vmatprep.mubr.bf16.mxu1 %v1349_v11  ;;  %v1351_v13 = vld [vmem:[%s1783_s0 + $0xc0] sm:$0xff]   ;;  %v1352_v16 = vld [vmem:[%s1783_s0 + $0xc8] sm:$0xff]  }
   0x6   :  { %v1330_v14 = vld [vmem:[%s1783_s0 + $0x18] sm:$0xff]   ;;  %v1331_v15 = vld [vmem:[%s1783_s0 + $0x20] sm:$0xff]   ;;  %v1353_v17 = vld [vmem:[%s1783_s0 + $0xd0] sm:$0xff]  }
   0x7   :  { %1201 = vmatpush3.bf16.msra.mxu0 %v1320_v1  ;;  %1307 = vmatpush3.bf16.msra.mxu1 %v1320_v1  ;;  %v1332_v18 = vld [vmem:[%s1783_s0 + $0x28] sm:$0xff]   ;;  %v1354_v19 = vld [vmem:[%s1783_s0 + $0xd8] sm:$0xff]   ;;  %v1333_v20 = vld [vmem:[%s1783_s0 + $0x30] sm:$0xff]  }
   0x8   :  { %1202 = vmatprep.subr.bf16.mxu0 %v1321_v2  ;;  %1300 = vmatprep.subr.bf16.mxu1 %v1321_v2  ;;  %v1355_v21 = vld [vmem:[%s1783_s0 + $0xe0] sm:$0xff]  }
   0xb   :  { %1203 = vmatpush3.bf16.msra.mxu0 %v1321_v2  ;;  %1308 = vmatpush3.bf16.msra.mxu1 %v1321_v2 }
   0xc   :  { %1204 = vmatprep.subr.bf16.mxu0 %v1322_v3  ;;  %1301 = vmatprep.subr.bf16.mxu1 %v1322_v3 }
   0xf   :  { %1205 = vmatpush3.bf16.msra.mxu0 %v1322_v3  ;;  %1309 = vmatpush3.bf16.msra.mxu1 %v1322_v3 }
  0x10   :  { %1206 = vmatprep.subr.bf16.mxu0 %v1323_v5  ;;  %1302 = vmatprep.subr.bf16.mxu1 %v1323_v5 }
  0x13   :  { %1207 = vmatpush3.bf16.msra.mxu0 %v1323_v5  ;;  %1310 = vmatpush3.bf16.msra.mxu1 %v1323_v5 }
  0x14   :  { %1208 = vmatprep.subr.bf16.mxu0 %v1324_v6  ;;  %1303 = vmatprep.subr.bf16.mxu1 %v1324_v6 }
  0x17   :  { %1209 = vmatpush3.bf16.msra.mxu0 %v1324_v6  ;;  %1311 = vmatpush3.bf16.msra.mxu1 %v1324_v6 }
  0x18   :  { %1210 = vmatprep.subr.bf16.mxu0 %v1325_v7  ;;  %1304 = vmatprep.subr.bf16.mxu1 %v1325_v7 }
  0x1b   :  { %1211 = vmatpush3.bf16.msra.mxu0 %v1325_v7  ;;  %1312 = vmatpush3.bf16.msra.mxu1 %v1325_v7 }
  0x1c   :  { %1212 = vmatprep.subr.bf16.mxu0 %v1326_v8  ;;  %1305 = vmatprep.subr.bf16.mxu1 %v1326_v8 }
  0x1f   :  { %1213 = vmatpush3.bf16.msra.mxu0 %v1326_v8  ;;  %1313 = vmatpush3.bf16.msra.mxu1 %v1326_v8 }
  0x22   :  { %1215 = vmatmul.mubr.bf16.vlgmr.msra.gmra.mxu0 %v1328_v9  ;;  %1259 = vmatmul.mubr.bf16.vlgmr.msra.gmra.mxu1 %v1350_v12 }
  0x23   :  { %1218 = vmatprep.mubr.bf16.mxu0 %v1329_v10  ;;  %1262 = vmatprep.mubr.bf16.mxu1 %v1351_v13 }
  0x2a   :  { %1219 = vmatmul.mubr.bf16.gmra.mxu0 %v1330_v14  ;;  %1263 = vmatmul.mubr.bf16.gmra.mxu1 %v1352_v16 }
  0x2b   :  { %1222 = vmatprep.mubr.bf16.mxu0 %v1331_v15  ;;  %1266 = vmatprep.mubr.bf16.mxu1 %v1353_v17 }
  0x32   :  { %1223 = vmatmul.mubr.bf16.gmra.mxu0 %v1332_v18  ;;  %1267 = vmatmul.mubr.bf16.gmra.mxu1 %v1354_v19 }
  0x33   :  { %15 = vsyncpa [#allocation5], 0  ;;  %1226 = vmatprep.mubr.bf16.mxu0 %v1333_v20  ;;  %1270 = vmatprep.mubr.bf16.mxu1 %v1355_v21  ;;  %v1334_v22 = vld [vmem:[%s1783_s0 + $0x38] sm:$0xff]   ;;  %v1356_v23 = vld [vmem:[%s1783_s0 + $0xe8] sm:$0xff]   ;;  %v1435_v41 = vmov 0.0   ;;  %vm1436_vm0 = vmmov 0  }
  0x34   :  { %v1335_v24 = vld [vmem:[%s1783_s0 + $0x40] sm:$0xff]   ;;  %v1357_v25 = vld [vmem:[%s1783_s0 + $0xf0] sm:$0xff]   ;;  %v1336_v26 = vld [vmem:[%s1783_s0 + $0x48] sm:$0xff]   ;;  %1278 = vmatprep.subr.bf16.mxu1 %v1435_v41  ;;  %vm785_vm1 = vcmask 1040384   ;;  %s1438_s17 = smov [#allocation2]  }
  0x35   :  { %v1358_v27 = vld [vmem:[%s1783_s0 + $0xf8] sm:$0xff]   ;;  %v1337_v28 = vld [vmem:[%s1783_s0 + $0x50] sm:$0xff]   ;;  %v1339_v30 = vld [vmem:[%s1783_s0 + $0x60] sm:$0xff]   ;;  %s1061_s18 = sshll.u32 %s1438_s17, 4  ;;  %s1062_s18 = int_to_ptr.vmem [resolvable:$true] %s1061_s18 }
  0x36   :  { %v1338_v29 = vld [vmem:[%s1783_s0 + $0x58] sm:$0xff]   ;;  %v1340_v31 = vld [vmem:[%s1783_s0 + $0x68] sm:$0xff]   ;;  %v1341_v32 = vld [vmem:[%s1783_s0 + $0x70] sm:$0xff]   ;;  %s1391_s20 = scalar_lea.vmem %s1062_s18, 32  ;;  %p1396_p1 = scmp.lt.s32.totalorder %s1062_s18, %s1062_s18 }
  0x37   :  { %v1342_v33 = vld [vmem:[%s1783_s0 + $0x78] sm:$0xff]   ;;  %v1343_v34 = vld [vmem:[%s1783_s0 + $0x80] sm:$0xff]   ;;  %v1344_v35 = vld [vmem:[%s1783_s0 + $0x88] sm:$0xff]   ;;  %p1392_p0 = scmp.ne.s32.totalorder %s1062_s18, %s1391_s20  ;;  %p1397_p2 = scmp.lt.s32.totalorder %s1391_s20, %s1391_s20 }
  0x38   :  { %v1345_v36 = vld [vmem:[%s1783_s0 + $0x90] sm:$0xff]   ;;  %v1346_v37 = vld [vmem:[%s1783_s0 + $0x98] sm:$0xff]   ;;  %v1347_v38 = vld [vmem:[%s1783_s0 + $0xa0] sm:$0xff]  }
  0x39   :  { %v1348_v39 = vld [vmem:[%s1783_s0 + $0xa8] sm:$0xff]   ;;  %v1359_v40 = vld [vmem:[%s1786_s3 + $0x38] sm:$0xff]   ;;  %v1360_v42 = vld [vmem:[%s1786_s3 + $0x30] sm:$0xff]   ;;  %p1398_p3 = por %p1397_p2, %p1396_p1 }
  0x3a   :  { %1227 = vmatmul.mubr.bf16.gmra.mxu0 %v1334_v22  ;;  %1271 = vmatmul.mubr.bf16.gmra.mxu1 %v1356_v23  ;;  %v1361_v44 = vld [vmem:[%s1786_s3 + $0x28] sm:$0xff]   ;;  %v1617_v46 = vld [vmem:[%s1785_s2] ss:$0 sm:$0xff]  ;;  %v1363_v57 = vld [vmem:[%s1786_s3 + $0x18] sm:$0xff]  }
  0x3b   :  { %1230 = vmatprep.mubr.bf16.mxu0 %v1335_v24  ;;  %1274 = vmatprep.mubr.bf16.mxu1 %v1357_v25  ;;  %v1362_v49 = vld [vmem:[%s1786_s3 + $0x20] sm:$0xff]   ;;  %v1364_v1 = vld [vmem:[%s1786_s3 + $0x10] sm:$0xff]   ;;  %v1365_v11 = vld [vmem:[%s1786_s3 + $0x8] sm:$0xff]   ;;  %p1399_p4 = pnand %p1398_p3, %p1392_p0 }
  0x3c   :  { %1279 = vmatpush3.bf16.msra.mxu1 %v1359_v40  ;;  %v1366_v16 = vld [vmem:[%s1786_s3] sm:$0xff]  }
  0x3d   :  { %1280 = vmatprep.subr.bf16.mxu1 %v1435_v41 }
  0x40   :  { %1281 = vmatpush3.bf16.msra.mxu1 %v1360_v42 }
  0x41   :  { %1282 = vmatprep.subr.bf16.mxu1 %v1435_v41 }
  0x42   :  { %1231 = vmatmul.mubr.bf16.gmra.mxu0 %v1336_v26  ;;  %1275 = vmatmul.mubr.bf16.gmra.mxu1 %v1358_v27 }
  0x43   :  { %1234 = vmatprep.mubr.bf16.mxu0 %v1337_v28  ;;  %1294 = vmatprep.mubr.msk.bf16.mxu1 %vm1436_vm0, %v1435_v41 }
  0x44   :  { %1283 = vmatpush3.bf16.msra.mxu1 %v1361_v44 }
  0x45   :  { %1284 = vmatprep.subr.bf16.mxu1 %v1435_v41 }
  0x48   :  { %1285 = vmatpush3.bf16.msra.mxu1 %v1362_v49 }
  0x49   :  { %1286 = vmatprep.subr.bf16.mxu1 %v1435_v41 }
  0x4a   :  { %1235 = vmatmul.mubr.bf16.gmra.mxu0 %v1338_v29 }
  0x4b   :  { %1238 = vmatprep.mubr.bf16.mxu0 %v1339_v30  ;;  %v1369_v30 = vld [vmem:[%s1788_s5 + $0x74] ss:$8 sps:$4 sm:$0xff]  }
  0x4c   :  { %1287 = vmatpush3.bf16.msra.mxu1 %v1363_v57 }
  0x4d   :  { %1288 = vmatprep.subr.bf16.mxu1 %v1435_v41 }
  0x50   :  { %1289 = vmatpush3.bf16.msra.mxu1 %v1364_v1 }
  0x51   :  { %1290 = vmatprep.subr.bf16.mxu1 %v1435_v41 }
  0x52   :  { %1239 = vmatmul.mubr.bf16.gmra.mxu0 %v1340_v31 }
  0x53   :  { %1242 = vmatprep.mubr.bf16.mxu0 %v1341_v32 }
  0x54   :  { %1291 = vmatpush3.bf16.msra.mxu1 %v1365_v11 }
  0x55   :  { %1292 = vmatprep.subr.bf16.mxu1 %v1435_v41 }
  0x58   :  { %1293 = vmatpush3.bf16.msra.mxu1 %v1366_v16 }
  0x59   :  { %1010 = vmatprep.subr.bf16.mxu1 %v1369_v30 }
  0x5a   :  { %1243 = vmatmul.mubr.bf16.gmra.mxu0 %v1342_v33 }
  0x5b   :  { %1246 = vmatprep.mubr.bf16.mxu0 %v1343_v34 }
  0x62   :  { %1247 = vmatmul.mubr.bf16.gmra.mxu0 %v1344_v35 }
  0x63   :  { %1250 = vmatprep.mubr.bf16.mxu0 %v1345_v36 }
  0x6a   :  { %1251 = vmatmul.mubr.bf16.gmra.mxu0 %v1346_v37 }
  0x6b   :  { %1254 = vmatprep.mubr.bf16.mxu0 %v1347_v38 }
  0x72   :  { %1255 = vmatmul.mubr.bf16.gmra.mxu0 %v1348_v39 }
  0xe2   :  { %v1216_v43 = vpop.f32.mrf.mxu0 }
  0xe3   :  { %v401_v51 = vadd.f32 %v1216_v43, %v1617_v46 }
  0xe4   :  { %v392_v45 = vpop.f32.mrf.mxu0 }
  0xe5   :  { %v393_v48 = vadd.f32 %v1617_v46, %v392_v45  ;;  %v649_v59 = vmax.f32 %v401_v51, 0.0 }
  0xe6   :  { %v1217_v47 = vpop.f32.mrf.mxu0 }
  0xe7   :  { %v647_v54 = vmax.f32 %v393_v48, 0.0  ;;  %v404_v55 = vadd.f32 %v1217_v47, %v1617_v46 }
  0xe8   :  { %v395_v50 = vpop.f32.mrf.mxu0 }
  0xe9   :  { %v396_v52 = vadd.f32 %v1617_v46, %v395_v50  ;;  %v650_v63 = vmax.f32 %v404_v55, 0.0 }
  0xea   :  { %v1220_v53 = vpop.f32.mrf.mxu0 }
  0xeb   :  { %v648_v56 = vmax.f32 %v396_v52, 0.0  ;;  %v417_v3 = vadd.f32 %v1220_v53, %v1617_v46 }
  0xec   :  { %v408_v58 = vpop.f32.mrf.mxu0 }
  0xed   :  { %v711_v60 = vadd.f32 %v648_v56, %v647_v54  ;;  %v409_v61 = vadd.f32 %v1617_v46, %v408_v58  ;;  %v653_v13 = vmax.f32 %v417_v3, 0.0 }
  0xee   :  { %v1221_v62 = vpop.f32.mrf.mxu0 }
  0xef   :  { %v712_v0 = vadd.f32 %v711_v60, %v649_v59  ;;  %v651_v4 = vmax.f32 %v409_v61, 0.0  ;;  %v420_v9 = vadd.f32 %v1221_v62, %v1617_v46 }
  0xf0   :  { %v411_v2 = vpop.f32.mrf.mxu0 }
  0xf1   :  { %v713_v5 = vadd.f32 %v712_v0, %v650_v63  ;;  %v412_v6 = vadd.f32 %v1617_v46, %v411_v2  ;;  %v654_v18 = vmax.f32 %v420_v9, 0.0 }
  0xf2   :  { %v1224_v7 = vpop.f32.mrf.mxu0 }
  0xf3   :  { %v714_v8 = vadd.f32 %v713_v5, %v651_v4  ;;  %v652_v10 = vmax.f32 %v412_v6, 0.0  ;;  %v433_v21 = vadd.f32 %v1224_v7, %v1617_v46  ;;  %v1658_v7 = vpop.f32.mrf.mxu1 }
  0xf4   :  { %v424_v12 = vpop.f32.mrf.mxu0 }
  0xf5   :  { %v715_v14 = vadd.f32 %v714_v8, %v652_v10  ;;  %v425_v15 = vadd.f32 %v1617_v46, %v424_v12  ;;  %v657_v31 = vmax.f32 %v433_v21, 0.0 }
  0xf6   :  { %v1225_v17 = vpop.f32.mrf.mxu0 }
  0xf7   :  { %v716_v19 = vadd.f32 %v715_v14, %v653_v13  ;;  %v655_v22 = vmax.f32 %v425_v15, 0.0  ;;  %v436_v27 = vadd.f32 %v1225_v17, %v1617_v46  ;;  %v1663_v17 = vpop.f32.mrf.mxu1 }
  0xf8   :  { %v427_v20 = vpop.f32.mrf.mxu0 }
  0xf9   :  { %v717_v23 = vadd.f32 %v716_v19, %v654_v18  ;;  %v428_v24 = vadd.f32 %v1617_v46, %v427_v20  ;;  %v658_v35 = vmax.f32 %v436_v27, 0.0 }
  0xfa   :  { %v1228_v25 = vpop.f32.mrf.mxu0 }
  0xfb   :  { %v718_v26 = vadd.f32 %v717_v23, %v655_v22  ;;  %v656_v28 = vmax.f32 %v428_v24, 0.0  ;;  %v449_v38 = vadd.f32 %v1228_v25, %v1617_v46  ;;  %v1666_v25 = vpop.f32.mrf.mxu1 }
  0xfc   :  { %v440_v29 = vpop.f32.mrf.mxu0 }
  0xfd   :  { %v719_v32 = vadd.f32 %v718_v26, %v656_v28  ;;  %v441_v33 = vadd.f32 %v1617_v46, %v440_v29  ;;  %v661_v48 = vmax.f32 %v449_v38, 0.0 }
  0xfe   :  { %v1229_v34 = vpop.f32.mrf.mxu0 }
  0xff   :  { %v720_v36 = vadd.f32 %v719_v32, %v657_v31  ;;  %v659_v39 = vmax.f32 %v441_v33, 0.0  ;;  %v452_v44 = vadd.f32 %v1229_v34, %v1617_v46 }
 0x100   :  { %v443_v37 = vpop.f32.mrf.mxu0 }
 0x101   :  { %v721_v40 = vadd.f32 %v720_v36, %v658_v35  ;;  %v444_v41 = vadd.f32 %v1617_v46, %v443_v37  ;;  %v662_v52 = vmax.f32 %v452_v44, 0.0  ;;  %v1671_v35 = vpop.f32.mrf.mxu1 }
 0x102   :  { %v1232_v42 = vpop.f32.mrf.mxu0 }
 0x103   :  { %v722_v43 = vadd.f32 %v721_v40, %v659_v39  ;;  %v660_v45 = vmax.f32 %v444_v41, 0.0  ;;  %v465_v55 = vadd.f32 %v1232_v42, %v1617_v46 }
 0x104   :  { %v456_v47 = vpop.f32.mrf.mxu0 }
 0x105   :  { %v723_v49 = vadd.f32 %v722_v43, %v660_v45  ;;  %v457_v50 = vadd.f32 %v1617_v46, %v456_v47  ;;  %v665_v0 = vmax.f32 %v465_v55, 0.0  ;;  %v1674_v43 = vpop.f32.mrf.mxu1 }
 0x106   :  { %v1233_v51 = vpop.f32.mrf.mxu0 }
 0x107   :  { %v724_v53 = vadd.f32 %v723_v49, %v661_v48  ;;  %v663_v56 = vmax.f32 %v457_v50, 0.0  ;;  %v468_v61 = vadd.f32 %v1233_v51, %v1617_v46 }
 0x108   :  { %v459_v54 = vpop.f32.mrf.mxu0 }
 0x109   :  { %v725_v57 = vadd.f32 %v724_v53, %v662_v52  ;;  %v460_v58 = vadd.f32 %v1617_v46, %v459_v54  ;;  %v666_v4 = vmax.f32 %v468_v61, 0.0  ;;  %v1679_v54 = vpop.f32.mrf.mxu1 }
 0x10a   :  { %v1236_v59 = vpop.f32.mrf.mxu0 }
 0x10b   :  { %v726_v60 = vadd.f32 %v725_v57, %v663_v56  ;;  %v664_v62 = vmax.f32 %v460_v58, 0.0  ;;  %v481_v8 = vadd.f32 %v1236_v59, %v1617_v46 }
 0x10c   :  { %v472_v63 = vpop.f32.mrf.mxu0 }
 0x10d   :  { %v727_v1 = vadd.f32 %v726_v60, %v664_v62  ;;  %v473_v2 = vadd.f32 %v1617_v46, %v472_v63  ;;  %v669_v18 = vmax.f32 %v481_v8, 0.0  ;;  %v1682_v62 = vpop.f32.mrf.mxu1 }
 0x10e   :  { %v1237_v3 = vpop.f32.mrf.mxu0 }
 0x10f   :  { %v728_v5 = vadd.f32 %v727_v1, %v665_v0  ;;  %v667_v9 = vmax.f32 %v473_v2, 0.0  ;;  %v484_v14 = vadd.f32 %v1237_v3, %v1617_v46  ;;  %v587_v8 = vpop.f32.mrf.mxu1 }
 0x110   :  { %v475_v6 = vpop.f32.mrf.mxu0 }
 0x111   :  { %v729_v10 = vadd.f32 %v728_v5, %v666_v4  ;;  %v476_v11 = vadd.f32 %v1617_v46, %v475_v6  ;;  %v670_v22 = vmax.f32 %v484_v14, 0.0 }
 0x112   :  { %v1240_v12 = vpop.f32.mrf.mxu0 }
 0x113   :  { %v730_v13 = vadd.f32 %v729_v10, %v667_v9  ;;  %v668_v15 = vmax.f32 %v476_v11, 0.0  ;;  %v497_v26 = vadd.f32 %v1240_v12, %v1617_v46 }
 0x114   :  { %v488_v16 = vpop.f32.mrf.mxu0 }
 0x115   :  { %v731_v19 = vadd.f32 %v730_v13, %v668_v15  ;;  %v489_v20 = vadd.f32 %v1617_v46, %v488_v16  ;;  %v673_v36 = vmax.f32 %v497_v26, 0.0  ;;  %v1268_v16 = vpop.f32.mrf.mxu1 }
 0x116   :  { %v1241_v21 = vpop.f32.mrf.mxu0 }
 0x117   :  { %v732_v23 = vadd.f32 %v731_v19, %v669_v18  ;;  %v671_v27 = vmax.f32 %v489_v20, 0.0  ;;  %v500_v32 = vadd.f32 %v1241_v21, %v1617_v46 }
 0x118   :  { %v491_v24 = vpop.f32.mrf.mxu0 }
 0x119   :  { %v733_v28 = vadd.f32 %v732_v23, %v670_v22  ;;  %v492_v29 = vadd.f32 %v1617_v46, %v491_v24  ;;  %v674_v40 = vmax.f32 %v500_v32, 0.0 }
 0x11a   :  { %v1244_v30 = vpop.f32.mrf.mxu0 }
 0x11b   :  { %v734_v31 = vadd.f32 %v733_v28, %v671_v27  ;;  %v672_v33 = vmax.f32 %v492_v29, 0.0  ;;  %v513_v44 = vadd.f32 %v1244_v30, %v1617_v46  ;;  %v600_v28 = vpop.f32.mrf.mxu1 }
 0x11c   :  { %v504_v34 = vpop.f32.mrf.mxu0 }
 0x11d   :  { %v735_v37 = vadd.f32 %v734_v31, %v672_v33  ;;  %v505_v38 = vadd.f32 %v1617_v46, %v504_v34  ;;  %v677_v55 = vmax.f32 %v513_v44, 0.0 }
 0x11e   :  { %v1245_v39 = vpop.f32.mrf.mxu0 }
 0x11f   :  { %v736_v41 = vadd.f32 %v735_v37, %v673_v36  ;;  %v675_v45 = vmax.f32 %v505_v38, 0.0  ;;  %v516_v51 = vadd.f32 %v1245_v39, %v1617_v46  ;;  %v1269_v37 = vpop.f32.mrf.mxu1 }
 0x120   :  { %v507_v42 = vpop.f32.mrf.mxu0 }
 0x121   :  { %v737_v47 = vadd.f32 %v736_v41, %v674_v40  ;;  %v508_v48 = vadd.f32 %v1617_v46, %v507_v42  ;;  %v678_v58 = vmax.f32 %v516_v51, 0.0 }
 0x122   :  { %v1248_v49 = vpop.f32.mrf.mxu0 }
 0x123   :  { %v738_v50 = vadd.f32 %v737_v47, %v675_v45  ;;  %v676_v52 = vmax.f32 %v508_v48, 0.0  ;;  %v529_v0 = vadd.f32 %v1248_v49, %v1617_v46  ;;  %v603_v47 = vpop.f32.mrf.mxu1  ;;  %v569_v49 = vadd.f32 %v1617_v46, %v1663_v17 }
 0x124   :  { %v520_v53 = vpop.f32.mrf.mxu0 }
 0x125   :  { %v739_v56 = vadd.f32 %v738_v50, %v676_v52  ;;  %v521_v60 = vadd.f32 %v1617_v46, %v520_v53  ;;  %v681_v9 = vmax.f32 %v529_v0, 0.0  ;;  %v572_v53 = vadd.f32 %v1617_v46, %v1671_v35 }
 0x126   :  { %v1249_v57 = vpop.f32.mrf.mxu0  ;;  %v588_v35 = vadd.f32 %v1617_v46, %v587_v8  ;;  %v604_v8 = vadd.f32 %v1617_v46, %v603_v47 }
 0x127   :  { %v740_v59 = vadd.f32 %v739_v56, %v677_v55  ;;  %v679_v3 = vmax.f32 %v521_v60, 0.0  ;;  %v532_v4 = vadd.f32 %v1249_v57, %v1617_v46  ;;  %v1272_v55 = vpop.f32.mrf.mxu1  ;;  %v577_v56 = vadd.f32 %v1658_v7, %v1617_v46 }
 0x128   :  { %v523_v61 = vpop.f32.mrf.mxu0  ;;  %v691_v57 = vmax.f32 %v569_v49, 0.0  ;;  %v692_v60 = vmax.f32 %v572_v53, 0.0  ;;  %v593_v7 = vadd.f32 %v1674_v43, %v1617_v46 }
 0x129   :  { %v1684_v63 = vadd.f32 %v740_v59, %v678_v58  ;;  %v524_v1 = vadd.f32 %v1617_v46, %v523_v61  ;;  %v682_v13 = vmax.f32 %v532_v4, 0.0  ;;  %v580_v59 = vadd.f32 %v1666_v25, %v1617_v46  ;;  %v616_v0 = vpop.f32.mrf.mxu1 }
 0x12a   :  { %v1252_v2 = vpop.f32.mrf.mxu0  ;;  %v596_v25 = vadd.f32 %v1682_v62, %v1617_v46 }
 0x12b   :  { %v680_v5 = vmax.f32 %v524_v1, 0.0  ;;  %v545_v18 = vadd.f32 %v1252_v2, %v1617_v46  ;;  %v693_v1 = vmax.f32 %v577_v56, 0.0  ;;  %v585_v2 = vadd.f32 %v1617_v46, %v1679_v54 }
 0x12c   :  { %v536_v6 = vpop.f32.mrf.mxu0  ;;  %v601_v54 = vadd.f32 %v1617_v46, %v600_v28 }
 0x12d   :  { %v748_v10 = vadd.f32 %v680_v5, %v679_v3  ;;  %v537_v11 = vadd.f32 %v1617_v46, %v536_v6  ;;  %v685_v29 = vmax.f32 %v545_v18, 0.0  ;;  %v694_v3 = vmax.f32 %v580_v59, 0.0  ;;  %v1273_v5 = vpop.f32.mrf.mxu1 }
 0x12e   :  { %v1253_v12 = vpop.f32.mrf.mxu0  ;;  %v695_v6 = vmax.f32 %v585_v2, 0.0  ;;  %v699_v43 = vmax.f32 %v601_v54, 0.0  ;;  %v1376_v54 = vld [vmem:[%s1788_s5 + $0x40] ss:$8 sps:$4 sm:$0xff]  }
 0x12f   :  { %v749_v14 = vadd.f32 %v748_v10, %v681_v9  ;;  %v683_v19 = vmax.f32 %v537_v11, 0.0  ;;  %v548_v24 = vadd.f32 %v1253_v12, %v1617_v46  ;;  %v696_v11 = vmax.f32 %v588_v35, 0.0  ;;  %v619_v12 = vpop.f32.mrf.mxu1 }
 0x130   :  { %v539_v15 = vpop.f32.mrf.mxu0 }
 0x131   :  { %v750_v20 = vadd.f32 %v749_v14, %v682_v13  ;;  %v540_v21 = vadd.f32 %v1617_v46, %v539_v15  ;;  %v686_v33 = vmax.f32 %v548_v24, 0.0  ;;  %v697_v13 = vmax.f32 %v593_v7, 0.0 }
 0x132   :  { %v1256_v22 = vpop.f32.mrf.mxu0  ;;  %v698_v15 = vmax.f32 %v596_v25, 0.0  ;;  %v700_v24 = vmax.f32 %v604_v8, 0.0  ;;  %v1372_v25 = vld [vmem:[%s1788_s5 + $0x64] ss:$8 sps:$4 sm:$0xff]  }
 0x133   :  { %v751_v23 = vadd.f32 %v750_v20, %v683_v19  ;;  %v684_v26 = vmax.f32 %v540_v21, 0.0  ;;  %v561_v38 = vadd.f32 %v1256_v22, %v1617_v46  ;;  %v1276_v19 = vpop.f32.mrf.mxu1  ;;  %v609_v20 = vadd.f32 %v1268_v16, %v1617_v46  ;;  %v1384_v8 = vld [vmem:[%s1788_s5 + $0x24] ss:$8 sps:$4 sm:$0xff]  }
 0x134   :  { %v552_v27 = vpop.f32.mrf.mxu0  ;;  %v641_v49 = vadd.f32 %v1276_v19, %v1617_v46  ;;  %v1382_v19 = vld [vmem:[%s1788_s5 + $0x20] ss:$8 sps:$4 sm:$0xff]  }
 0x135   :  { %v752_v30 = vadd.f32 %v751_v23, %v684_v26  ;;  %v553_v31 = vadd.f32 %v1617_v46, %v552_v27  ;;  %v689_v48 = vmax.f32 %v561_v38, 0.0  ;;  %v612_v23 = vadd.f32 %v1269_v37, %v1617_v46  ;;  %v632_v62 = vpop.f32.mrf.mxu1 }
 0x136   :  { %v1257_v32 = vpop.f32.mrf.mxu0  ;;  %v701_v26 = vmax.f32 %v609_v20, 0.0  ;;  %v628_v38 = vadd.f32 %v1273_v5, %v1617_v46  ;;  %v1387_v20 = vld [vmem:[%s1788_s5 + $0x14] ss:$8 sps:$4 sm:$0xff]  }
 0x137   :  { %v753_v34 = vadd.f32 %v752_v30, %v685_v29  ;;  %v687_v39 = vmax.f32 %v553_v31, 0.0  ;;  %v564_v44 = vadd.f32 %v1257_v32, %v1617_v46  ;;  %v617_v29 = vadd.f32 %v1617_v46, %v616_v0  ;;  %v1277_v32 = vpop.f32.mrf.mxu1 }
 0x138   :  { %v555_v36 = vpop.f32.mrf.mxu0  ;;  %v702_v30 = vmax.f32 %v612_v23, 0.0  ;;  %v620_v31 = vadd.f32 %v1617_v46, %v619_v12  ;;  %v644_v53 = vadd.f32 %v1277_v32, %v1617_v46  ;;  %v1375_v12 = vld [vmem:[%s1788_s5 + $0x54] ss:$8 sps:$4 sm:$0xff]   ;;  %v1437_v23 = vmov 0  }
 0x139   :  { %v754_v40 = vadd.f32 %v753_v34, %v686_v33  ;;  %v556_v41 = vadd.f32 %v1617_v46, %v555_v36  ;;  %v690_v51 = vmax.f32 %v564_v44, 0.0  ;;  %v625_v33 = vadd.f32 %v1272_v55, %v1617_v46  ;;  %v635_v37 = vpop.f32.mrf.mxu1 }
 0x13a   :  { %v703_v34 = vmax.f32 %v617_v29, 0.0  ;;  %v706_v44 = vmax.f32 %v628_v38, 0.0  ;;  %v636_v47 = vadd.f32 %v1617_v46, %v635_v37  ;;  %v710_v59 = vmax.f32 %v644_v53, 0.0 }
 0x13b   :  { %v755_v42 = vadd.f32 %v754_v40, %v687_v39  ;;  %v688_v45 = vmax.f32 %v556_v41, 0.0  ;;  %v704_v39 = vmax.f32 %v620_v31, 0.0  ;;  %v705_v40 = vmax.f32 %v625_v33, 0.0 }
 0x13c   :  { %v708_v55 = vmax.f32 %v636_v47, 0.0  ;;  %v920_v32 = vlaneseq }
 0x13d   :  { %v756_v50 = vadd.f32 %v755_v42, %v688_v45  ;;  %v633_v42 = vadd.f32 %v1617_v46, %v632_v62 }
 0x13e   :  { %v921_v33 = vshrl.u32 %v920_v32, 7 }
 0x13f   :  { %v757_v52 = vadd.f32 %v756_v50, %v689_v48  ;;  %v742_v48 = vrot.slane %v1684_v63, 4  ;;  %v707_v50 = vmax.f32 %v633_v42, 0.0 }
 0x141   :  { %v758_v58 = vadd.f32 %v757_v52, %v690_v51  ;;  %v743_v56 = vadd.f32 %v742_v48, %v1684_v63  ;;  %v1367_v63 = vld [vmem:[%s1788_s5 + $0x70] ss:$8 sps:$4 sm:$0xff]  }
 0x143   :  { %v759_v61 = vadd.f32 %v758_v58, %v691_v57  ;;  %v709_v57 = vmax.f32 %v641_v49, 0.0 }
 0x145   :  { %v760_v17 = vadd.f32 %v759_v61, %v692_v60  ;;  %v744_v61 = vrot.slane %v743_v56, 2 }
 0x147   :  { %v761_v4 = vadd.f32 %v760_v17, %v693_v1  ;;  %v745_v17 = vadd.f32 %v744_v61, %v743_v56 }
 0x149   :  { %v762_v9 = vadd.f32 %v761_v4, %v694_v3  ;;  %v746_v4 = vrot.slane %v745_v17, 1 }
 0x14b   :  { %v763_v10 = vadd.f32 %v762_v9, %v695_v6  ;;  %v747_v7 = vadd.f32 %v746_v4, %v745_v17 }
 0x14d   :  { %v764_v14 = vadd.f32 %v763_v10, %v696_v11  ;;  %v1370_v11 = vld [vmem:[%s1788_s5 + $0x60] ss:$8 sps:$4 sm:$0xff]  }
 0x14f   :  { %v765_v18 = vadd.f32 %v764_v14, %v697_v13  ;;  %v1373_v13 = vld [vmem:[%s1788_s5 + $0x50] ss:$8 sps:$4 sm:$0xff]   ;;  %v1378_v14 = vld [vmem:[%s1788_s5 + $0x44] ss:$8 sps:$4 sm:$0xff]  }
 0x151   :  { %v766_v21 = vadd.f32 %v765_v18, %v698_v15  ;;  %v1381_v15 = vld [vmem:[%s1788_s5 + $0x34] ss:$8 sps:$4 sm:$0xff]   ;;  %v1379_v18 = vld [vmem:[%s1788_s5 + $0x30] ss:$8 sps:$4 sm:$0xff]  }
 0x153   :  { %v767_v22 = vadd.f32 %v766_v21, %v699_v43  ;;  %v1385_v43 = vld [vmem:[%s1788_s5 + $0x10] ss:$8 sps:$4 sm:$0xff]   ;;  %v1390_v21 = vld [vmem:[%s1788_s5 + $0x4] ss:$8 sps:$4 sm:$0xff]  }
 0x155   :  { %v768_v27 = vadd.f32 %v767_v22, %v700_v24  ;;  %v1388_v22 = vld [vmem:[%s1788_s5] ss:$8 sps:$4 sm:$0xff]  }
 0x156   :  { %v1124_v24 = vld [vmem:[%s1787_s4] ss:$0 sm:$0xff]  ;;  %s1439_s4 = smov [#allocation4]  }
 0x157   :  { %v769_v28 = vadd.f32 %v768_v27, %v701_v26  ;;  %s1071_s19 = sshll.u32 %s1439_s4, 4  ;;  %s1072_s19 = int_to_ptr.vmem [resolvable:$true] %s1071_s19 }
 0x159   :  { %v770_v16 = vadd.f32 %v769_v28, %v702_v30 }
 0x15b   :  { %v771_v36 = vadd.f32 %v770_v16, %v703_v34  ;;  %v922_v34 = vsub.s32 0, %v921_v33  ;;  %v918_v16 = vld [vmem:[%s1789_s6] sm:$0x3] }
 0x15d   :  { %v772_v41 = vadd.f32 %v771_v36, %v704_v39  ;;  %v926_v36 = vsub.s32 1, %v921_v33  ;;  %v923_v38 = vrot.slane %v918_v16, %v922_v34 }
 0x15f   :  { %v773_v45 = vadd.f32 %v772_v41, %v705_v40  ;;  %v927_v39 = vrot.slane %v918_v16, %v926_v36 }
 0x161   :  { %v774_v51 = vadd.f32 %v773_v45, %v706_v44 }
 0x163   :  { %v775_v52 = vadd.f32 %v774_v51, %v707_v50 }
 0x165   :  { %v776_v58 = vadd.f32 %v775_v52, %v708_v55 }
 0x167   :  { %v777_v60 = vadd.f32 %v776_v58, %v709_v57 }
 0x169   :  { %v778_v0 = vadd.f32 %v777_v60, %v710_v59 }
 0x16b   :  { %v779_v1 = vrot.slane %v778_v0, 4 }
 0x16d   :  { %v780_v2 = vadd.f32 %v779_v1, %v778_v0 }
 0x16f   :  { %v781_v3 = vrot.slane %v780_v2, 2 }
 0x171   :  { %v782_v35 = vadd.f32 %v781_v3, %v780_v2 }
 0x173   :  { %v783_v5 = vrot.slane %v782_v35, 1 }
 0x175   :  { %v784_v6 = vadd.f32 %v783_v5, %v782_v35 }
 0x177   :  { %v786_v46 = vsel %vm785_vm1, %v747_v7, %v784_v6 }
 0x178   :  { %v787_v9 = vmul.f32 0.00390625, %v786_v46 }
 0x17a   :  { %v788_v10 = vpack.c.bf16 %v787_v9, %v787_v9 }
 0x17c   :  { %1295 = vmatmul.mubr.bf16.vlgmr.msra.gmra.mxu1 %v788_v10 }
 0x17d   :  { %1011 = vmatpush1.bf16.msra.mxu1 %v1367_v63  ;;  %1042 = vmatprep.mubr.bf16.mxu1 %v1437_v23 }
 0x17e   :  { %1012 = vmatprep.subr.bf16.mxu1 %v1372_v25 }
 0x181   :  { %1013 = vmatpush1.bf16.msra.mxu1 %v1370_v11 }
 0x182   :  { %1014 = vmatprep.subr.bf16.mxu1 %v1375_v12 }
 0x185   :  { %1015 = vmatpush1.bf16.msra.mxu1 %v1373_v13 }
 0x186   :  { %1016 = vmatprep.subr.bf16.mxu1 %v1378_v14 }
 0x189   :  { %1017 = vmatpush1.bf16.msra.mxu1 %v1376_v54 }
 0x18a   :  { %1018 = vmatprep.subr.bf16.mxu1 %v1381_v15 }
 0x18d   :  { %1019 = vmatpush1.bf16.msra.mxu1 %v1379_v18 }
 0x18e   :  { %1020 = vmatprep.subr.bf16.mxu1 %v1384_v8 }
 0x191   :  { %1021 = vmatpush1.bf16.msra.mxu1 %v1382_v19 }
 0x192   :  { %1022 = vmatprep.subr.bf16.mxu1 %v1387_v20 }
 0x195   :  { %1023 = vmatpush1.bf16.msra.mxu1 %v1385_v43 }
 0x196   :  { %1024 = vmatprep.subr.bf16.mxu1 %v1390_v21 }
 0x199   :  { %1025 = vmatpush1.bf16.msra.mxu1 %v1388_v22 }
 0x23c   :  { %v894_v62 = vpop.f32.mrf.mxu1 }
 0x23d   :  { %v895_v26 = vadd.f32 %v1124_v24, %v894_v62 }
 0x23e   :  { %v1296_v27 = vpop.f32.mrf.mxu1 }
 0x23f   :  { %v900_v29 = vmax.f32 %v895_v26, 0.0 }
 0x240   :  { %v897_v30 = vpop.f32.mrf.mxu1 }
 0x241   :  { %v901_v28 = vpack.c.bf16 %v900_v29, %v900_v29 }
 0x242   :  { %v1297_v31 = vpop.f32.mrf.mxu1 }
 0x243   :  { %1043 = vmatmul.mubr.bf16.vlgmr.msra.gmra.mxu1 %v901_v28 }
 0x303   :  { %v1044_v37 = vpop.f32.mrf.mxu1 }
 0x304   :  { %v1045_v40 = vadd.f32 %v1044_v37, %v923_v38 }
 0x305   :  { %v1046_v41 = vpop.f32.mrf.mxu1 }
 0x306   :  { %1051 = vst [vmem:[#allocation2] sm:$0x3] %v1045_v40  ;;  %v1047_v42 = vadd.f32 %v1046_v41, %v927_v39 }
 0x307   :  { %v1048_v44 = vpop.f32.mrf.mxu1 }
 0x308   :  { %1402 = shalt.err (!%p1399_p4)
}
 0x309   :  { %1064 = dma.vmem_to_hbm [thread:$0]  %s1062_s18, 32, %s1790_s7, [#allocation3]   ;;  %v1052_v45 = vadd.f32 %v1047_v42, %v1045_v40  ;;  %v1049_v47 = vpop.f32.mrf.mxu1 }
 0x30a   :  { %s1411_s0 = scalar_lea.vmem %s1072_s19, 32  ;;  %p1416_p6 = scmp.lt.s32.totalorder %s1072_s19, %s1072_s19 }
 0x30b   :  { %v1053_v48 = vmul.f32 0.5, %v1052_v45  ;;  %p1412_p5 = scmp.ne.s32.totalorder %s1072_s19, %s1411_s0  ;;  %p1417_p7 = scmp.lt.s32.totalorder %s1411_s0, %s1411_s0 }
 0x30d   :  { %1054 = vst [vmem:[#allocation4] sm:$0x3] %v1053_v48  ;;  %p1418_p8 = por %p1417_p7, %p1416_p6 }
 0x30f   :  { %p1419_p9 = pnand %p1418_p8, %p1412_p5 }
 0x311   :  { %1422 = shalt.err (!%p1419_p9)
}
 0x312   :  { %1074 = dma.vmem_to_hbm [thread:$0]  %s1072_s19, 32, %s1791_s8, [#allocation5]  }
 0x313   :  { %1431 = dma.done.wait [#allocation3], 32  }
 0x314   :  { %1432 = vsyncadd [#allocation3], 4294967264 }
 0x315   :  { %1433 = dma.done.wait [#allocation5], 32  }
 0x316   :  { %1434 = vsyncadd [#allocation5], 4294967264 }
 0x317   :  { %1081 = vsyncpa [#allocation3], 1 }
 0x318   :  { %1082 = vsyncpa [#allocation5], 1 }

</bundles_post_ra>
